<compile_context>
chip_gen: v6e
topology: v6e:2x2x1
jax: 0.10.0
libtpu: 0.0.40
codegen_flags: <defaults>
</compile_context>

<pallas_src>
import functools

import jax
import jax.numpy as jnp
from jax.experimental import pallas as pl
from jax.experimental.pallas import tpu as pltpu

_LANE = 128
_NEG_PAD = -1e30  # padding value for unused class lanes (exp underflows to 0)


def _ce_kernel(logits_ref, labels_ref, out_ref, *, batch):
    """Mean cross-entropy over the batch, written as a single SMEM scalar."""
    logits = logits_ref[...].astype(jnp.float32)                  # (B, Cp) lane-dense
    b, cp = logits.shape

    # Stable log-sum-exp over classes (padded lanes contribute exactly 0).
    m = jnp.max(logits, axis=-1, keepdims=True)                   # (B, 1)
    lse = m + jnp.log(jnp.sum(jnp.exp(logits - m), axis=-1, keepdims=True))

    # One-hot gather of the label logit (labels are always < true C, so
    # padded lanes never match).
    labels = labels_ref[...]                                      # (B, 1) int32
    col = jax.lax.broadcasted_iota(jnp.int32, (b, cp), 1)
    onehot = (col == labels).astype(jnp.float32)                  # (B, Cp)
    picked = jnp.sum(logits * onehot, axis=-1, keepdims=True)     # (B, 1)

    # mean over the batch -> scalar in SMEM
    out_ref[0, 0] = jnp.sum(lse - picked) * (1.0 / batch)


def cross_entropy_mean(logits, label):
    """CrossEntropyLoss (mean reduction) of logits (B, C) against label (B,)."""
    b, c = logits.shape
    cp = ((c + _LANE - 1) // _LANE) * _LANE                       # pad classes to 128 lanes
    logits_p = jnp.pad(logits.astype(jnp.float32), ((0, 0), (0, cp - c)),
                       constant_values=_NEG_PAD)
    labels2d = label.reshape(b, 1).astype(jnp.int32)

    out = pl.pallas_call(
        functools.partial(_ce_kernel, batch=b),
        out_shape=jax.ShapeDtypeStruct((1, 1), jnp.float32),
        in_specs=[
            pl.BlockSpec(memory_space=pltpu.MemorySpace.VMEM),    # logits (B, Cp)
            pl.BlockSpec(memory_space=pltpu.MemorySpace.VMEM),    # labels (B, 1)
        ],
        out_specs=pl.BlockSpec(memory_space=pltpu.MemorySpace.SMEM),
    )(logits_p, labels2d)
    return out[0, 0]


def arvit_cross_entropy(preds, label):
    """Matches ARViT_CrossEntropy.forward: CE(preds[0], label)."""
    return cross_entropy_mean(preds[0], label)


if __name__ == "__main__":
    key = jax.random.PRNGKey(0)
    k1, k2, k3 = jax.random.split(key, 3)

    B, C = 2, 10
    logits = jax.random.normal(k1, (B, C), jnp.float32)           # preds[0]
    label = jax.random.randint(k2, (B,), 0, C, jnp.int32)
    # preds is a list in the reference module; extra entries are unused by this loss.
    extra = jax.random.normal(k3, (B, 8, 8), jnp.float32)
    preds = (logits, extra)

    loss = arvit_cross_entropy(preds, label)
    jax.block_until_ready(loss)

    # Pure-JAX reference (same math as torch.nn.CrossEntropyLoss, mean reduction).
    ref = jnp.mean(
        jax.nn.logsumexp(logits, axis=-1)
        - jnp.take_along_axis(logits, label[:, None], axis=-1)[:, 0])
    assert jnp.abs(loss - ref) < 1e-4, (loss, ref)

    print("KERNEL_OK")
</pallas_src>

<mosaic_0001>
module attributes {stable_mosaic.version = 11 : i64} {
  func.func @_ce_kernel(%arg0: memref<2x128xf32, #tpu.memory_space<vmem>>, %arg1: memref<2x1xi32, #tpu.memory_space<vmem>>, %arg2: memref<1x1xf32, #tpu.memory_space<smem>>) attributes {dimension_semantics = [], scalar_prefetch = 0 : i64, scratch_operands = 0 : i64, tpu.core_type = #tpu.core_type<tc>} {
    %c0 = arith.constant 0 : index
    %c0_0 = arith.constant 0 : index
    %0 = vector.load %arg0[%c0, %c0_0] : memref<2x128xf32, #tpu.memory_space<vmem>>, vector<2x128xf32>
    %cst = arith.constant dense<0xFF800000> : vector<2xf32>
    %1 = vector.multi_reduction <maximumf>, %0, %cst [1] : vector<2x128xf32> to vector<2xf32>
    %2 = vector.shape_cast %1 : vector<2xf32> to vector<2x1xf32>
    %3 = vector.broadcast %2 : vector<2x1xf32> to vector<2x128xf32>
    %4 = arith.subf %0, %3 : vector<2x128xf32>
    %5 = math.exp %4 : vector<2x128xf32>
    %cst_1 = arith.constant dense<0.000000e+00> : vector<2xf32>
    %6 = vector.multi_reduction <add>, %5, %cst_1 [1] : vector<2x128xf32> to vector<2xf32>
    %7 = vector.shape_cast %6 : vector<2xf32> to vector<2x1xf32>
    %8 = math.log %7 : vector<2x1xf32>
    %9 = arith.addf %2, %8 : vector<2x1xf32>
    %c0_2 = arith.constant 0 : index
    %c0_3 = arith.constant 0 : index
    %10 = vector.load %arg1[%c0_2, %c0_3] : memref<2x1xi32, #tpu.memory_space<vmem>>, vector<2x1xi32>
    %11 = tpu.iota {dimensions = array<i32: 1>} : vector<2x128xi32>
    %12 = vector.broadcast %10 : vector<2x1xi32> to vector<2x128xi32>
    %13 = arith.cmpi eq, %11, %12 : vector<2x128xi32>
    %14 = arith.extui %13 : vector<2x128xi1> to vector<2x128xi32>
    %15 = arith.sitofp %14 : vector<2x128xi32> to vector<2x128xf32>
    %16 = arith.mulf %0, %15 : vector<2x128xf32>
    %cst_4 = arith.constant dense<0.000000e+00> : vector<2xf32>
    %17 = vector.multi_reduction <add>, %16, %cst_4 [1] : vector<2x128xf32> to vector<2xf32>
    %18 = vector.shape_cast %17 : vector<2xf32> to vector<2x1xf32>
    %19 = arith.subf %9, %18 : vector<2x1xf32>
    %20 = vector.shape_cast %19 : vector<2x1xf32> to vector<1x2x1xf32>
    %cst_5 = arith.constant dense<0.000000e+00> : vector<1xf32>
    %21 = vector.multi_reduction <add>, %20, %cst_5 [1, 2] : vector<1x2x1xf32> to vector<1xf32>
    %22 = vector.shape_cast %21 : vector<1xf32> to vector<1x1x1xf32>
    %23 = vector.extract %22[0, 0, 0] : f32 from vector<1x1x1xf32>
    %cst_6 = arith.constant 5.000000e-01 : f32
    %24 = arith.mulf %23, %cst_6 : f32
    %c0_7 = arith.constant 0 : index
    %c0_8 = arith.constant 0 : index
    %25 = memref.load %arg2[%c0_7, %c0_8] : memref<1x1xf32, #tpu.memory_space<smem>>
    memref.store %24, %arg2[%c0_7, %c0_8] : memref<1x1xf32, #tpu.memory_space<smem>>
    return
  }
}

</mosaic_0001>

<bundles_post_ra>
// kernel: tpu_custom_call.1
= control target key start
LH: loop header
LB: loop body
LE: loop exit
PB: predicated region body
PF: predicated region fallthrough
CT: control target
= control target key end

     0   :  { %vm13_vm0 = vcmask 1041408   ;;  %v88_v2 = vmov 0   ;;  %s118_s0 = inlined_call_operand.vmem [shape: f32[2,128], index: 0, kind: input, shape index: {}]   ;;  %s119_s1 = inlined_call_operand.vmem [shape: s32[2,1], index: 1, kind: input, shape index: {}]   ;;  %s120_s2 = inlined_call_operand.hbm [shape: f32[1,1], index: 2, kind: output, shape index: {}]  }
   0x1   :  { %v12_v0 = vld [vmem:[%s118_s0] sm:$0x3]  ;;  %73 = vset.pattern.permute.xlu0 %v88_v2 }
   0x2   :  { %v14_v1 = vsel %vm13_vm0, %v12_v0, -inf }
   0x3   :  { %7 = vsyncpa [#allocation3], 0  ;;  %15 = vmax.xlane.f32.xlu0 %v14_v1  ;;  %v26_v3 = vld [vmem:[%s119_s1] sm:$0x3]  ;;  %v27_v7 = vlaneseq  ;;  %v89_v10 = vmov 0.0   ;;  %vm40_vm2 = vcmask 1024  }
   0x4   :  { %s90_s13 = smov [#allocation2]  }
   0x5   :  { %v28_v8 = vand.u32 127, %v27_v7 }
  0x19   :  { %30 = vperm.xlu0 %73, %v26_v3  }
  0x8c   :  { %v16_v4 = vpop.xlane.xlu0 %15 }
  0x8d   :  { %v17_v5 = vsub.f32 %v12_v0, %v16_v4 }
  0x8f   :  { %v18_v6 = vmul.f32 1.442695, %v17_v5 }
  0x91   :  { %74 = vpow2.f32 %v18_v6 }
  0x94   :  { %v31_v9 = vpop.permute.xlu0 %30 }
  0x95   :  { %vm32_vm1 = vcmp.eq.s32.totalorder %v28_v8, %v31_v9 }
  0x96   :  { %v67_v11 = vsel %vm32_vm1, 1.0, %v89_v10 }
  0x97   :  { %v35_v12 = vmul.f32 %v67_v11, %v12_v0 }
  0x99   :  { %v36_v15 = vsel %vm13_vm0, %v35_v12, 0.0 }
  0x9e   :  { %v75_v13 = vpop.eup %74 }
  0x9f   :  { %v20_v14 = vsel %vm13_vm0, %v75_v13, 0.0 }
  0xa0   :  { %21 = vadd.xlane.f32.xlu1 %v20_v14 }
  0xa4   :  { %37 = vadd.xlane.f32.xlu1 %v36_v15 }
 0x129   :  { %v22_v16 = vpop.xlane.xlu1 %21 }
 0x12a   :  { %76 = vlog2.f32 %v22_v16 }
 0x12d   :  { %v38_v19 = vpop.xlane.xlu1 %37 }
 0x137   :  { %v77_v17 = vpop.eup %76 }
 0x138   :  { %v24_v18 = vmul.f32 0.6931472, %v77_v17 }
 0x13a   :  { %v25_v20 = vadd.f32 %v24_v18, %v16_v4 }
 0x13c   :  { %v39_v21 = vsub.f32 %v25_v20, %v38_v19 }
 0x13e   :  { %v41_v22 = vsel %vm40_vm2, %v39_v21, 0.0 }
 0x13f   :  { %42 = vadd.xlane.f32.xlu1 %v41_v22 }
 0x1c8   :  { %v43_v23 = vpop.xlane.xlu1 %42 }
 0x1c9   :  { %v44_v24 = vrot.slane %v43_v23, 4 }
 0x1cb   :  { %v45_v25 = vadd.f32 %v44_v24, %v43_v23 }
 0x1cd   :  { %v46_v26 = vrot.slane %v45_v25, 2 }
 0x1cf   :  { %v47_v27 = vadd.f32 %v46_v26, %v45_v25 }
 0x1d1   :  { %v48_v28 = vrot.slane %v47_v27, 1 }
 0x1d3   :  { %v49_v29 = vadd.f32 %v48_v28, %v47_v27 }
 0x1d5   :  { %68 = vpush %v49_v29 }
 0x206   :  { %s69_s0 = spop %68 }
 0x207   :  { %s51_s1 = smul.f32 0.5, %s69_s0 }
 0x209   :  { %53 = sst [smem:[#allocation2]] %s51_s1 }
 0x20a   :  { %61 = dma.smem_to_hbm %s90_s13, 16, %s120_s2, [#allocation3]  }
 0x20b   :  { %86 = dma.done.wait [#allocation3], 16  }
 0x20c   :  { %87 = vsyncadd [#allocation3], 4294967280 }
 0x20d   :  { %65 = sfence }
 0x20e   :  { %66 = vsyncpa [#allocation3], 1 }

</bundles_post_ra>
